<compile_context>
chip_gen: v7x
topology: tpu7x:2x2x1
jax: 0.10.0
libtpu: 0.0.40
codegen_flags: <defaults>
</compile_context>

<pallas_src>
import functools

import jax
import jax.numpy as jnp
from jax.experimental import pallas as pl
from jax.experimental.pallas import tpu as pltpu


def _film_kernel(text_ref, w_ref, bias_ref, feat_ref, out_ref, *, ts, bsz, c):
    # text:  (b, T)            bf16
    # w:     (1, T, 2*ts)      bf16   [gamma_tile | beta_tile] fused
    # bias:  (1, 1, 2*ts)      f32
    # feat:  (b*c, ts)         f32
    # out:   (b*c, ts)         f32
    text = text_ref[...]
    w = w_ref[0]                                   # (T, 2*ts)
    # Single fused MXU matmul, f32 accumulation.
    gb = jnp.dot(text, w, preferred_element_type=jnp.float32) + bias_ref[0]  # (b, 2*ts)

    gamma = gb[:, :ts]                             # (b, ts), lane-aligned slice
    beta = gb[:, ts:]                              # (b, ts)

    # Broadcast over the channel axis: rows of feat are (b outer, c inner).
    gamma_bc = jnp.broadcast_to(gamma[:, None, :], (bsz, c, ts)).reshape(bsz * c, ts)
    beta_bc = jnp.broadcast_to(beta[:, None, :], (bsz, c, ts)).reshape(bsz * c, ts)

    out_ref[...] = (gamma_bc * feat_ref[...] + beta_bc).astype(out_ref.dtype)


def _pick_tile(S, target=2048):
    """Largest multiple of 128 that divides S and is <= target (falls back to S)."""
    if S % 128 != 0:
        return S
    ts = 128
    while ts * 2 <= min(S, target) and S % (ts * 2) == 0:
        ts *= 2
    return ts


def film_spatial(feature, text, gamma_w, gamma_b, beta_w, beta_b, *, block_s=None):
    """feature: (b, c, d, h, w) float32; text: (b, text_dim) float32."""
    b, c, d, h, w = feature.shape
    S = d * h * w
    T = text.shape[1]
    assert gamma_w.shape == (T, S) and beta_w.shape == (T, S)
    assert gamma_b.shape == (S,) and beta_b.shape == (S,)

    if block_s is None:
        block_s = _pick_tile(S)
    assert S % block_s == 0
    assert block_s == S or block_s % 128 == 0
    n_tiles = S // block_s

    # ---- wrapper-side layout plumbing (outside the kernel) ----
    compute_dtype = jnp.bfloat16
    # Interleave gamma/beta weights per S-tile so each grid step sees one
    # contiguous (T, 2*block_s) fused weight block -> single matmul in-kernel.
    w_fused = jnp.concatenate(
        [gamma_w.reshape(T, n_tiles, block_s), beta_w.reshape(T, n_tiles, block_s)],
        axis=-1,
    ).transpose(1, 0, 2).astype(compute_dtype)                    # (n, T, 2*ts)
    b_fused = jnp.concatenate(
        [gamma_b.reshape(n_tiles, block_s), beta_b.reshape(n_tiles, block_s)],
        axis=-1,
    )[:, None, :].astype(jnp.float32)                             # (n, 1, 2*ts)
    text_c = text.astype(compute_dtype)                           # (b, T)
    feat_flat = feature.reshape(b * c, S)                         # sublane/lane dense

    kernel = functools.partial(_film_kernel, ts=block_s, bsz=b, c=c)

    itemsize = jnp.dtype(feature.dtype).itemsize
    flops = 2 * b * T * (2 * S) + 2 * b * c * S
    bytes_accessed = (
        w_fused.size * 2            # bf16 weights (dominant)
        + b_fused.size * 4
        + text_c.size * 2
        + 2 * feat_flat.size * itemsize  # feature in + out
    )

    out_flat = pl.pallas_call(
        kernel,
        out_shape=jax.ShapeDtypeStruct((b * c, S), feature.dtype),
        grid=(n_tiles,),
        in_specs=[
            pl.BlockSpec((b, T), lambda j: (0, 0)),                    # text (resident)
            pl.BlockSpec((1, T, 2 * block_s), lambda j: (j, 0, 0)),    # fused weights
            pl.BlockSpec((1, 1, 2 * block_s), lambda j: (j, 0, 0)),    # fused biases
            pl.BlockSpec((b * c, block_s), lambda j: (0, j)),          # feature tile
        ],
        out_specs=pl.BlockSpec((b * c, block_s), lambda j: (0, j)),
        compiler_params=pltpu.CompilerParams(
            dimension_semantics=("parallel",)),                        # megacore on v7x
        cost_estimate=pl.CostEstimate(
            flops=flops, transcendentals=0, bytes_accessed=bytes_accessed),
    )(text_c, w_fused, b_fused, feat_flat)

    return out_flat.reshape(b, c, d, h, w)


if __name__ == "__main__":
    # Small shapes consistent with the module's forward.
    b, c, d, h, w = 2, 4, 4, 8, 8          # spatial_dim = d*h*w = 256
    text_dim = 32
    S = d * h * w

    key = jax.random.PRNGKey(0)
    k_feat, k_text, k_gw, k_gb, k_bw, k_bb = jax.random.split(key, 6)

    feature = jax.random.normal(k_feat, (b, c, d, h, w), dtype=jnp.float32)
    text = jax.random.normal(k_text, (b, text_dim), dtype=jnp.float32)

    # Deterministic synthetic parameter init (xavier_uniform for weights,
    # PyTorch-Linear-style uniform for biases). Stored as (in, out) so the
    # kernel does text @ W directly.
    xav = (6.0 / (text_dim + S)) ** 0.5
    gamma_w = jax.random.uniform(k_gw, (text_dim, S), jnp.float32, -xav, xav)
    beta_w = jax.random.uniform(k_bw, (text_dim, S), jnp.float32, -xav, xav)
    bbound = 1.0 / (text_dim ** 0.5)
    gamma_b = jax.random.uniform(k_gb, (S,), jnp.float32, -bbound, bbound)
    beta_b = jax.random.uniform(k_bb, (S,), jnp.float32, -bbound, bbound)

    # block_s=128 -> 2-step grid: exercises the tiled / pipelined path.
    out = film_spatial(feature, text, gamma_w, gamma_b, beta_w, beta_b, block_s=128)
    out = jax.block_until_ready(out)
    assert out.shape == (b, c, d, h, w)

    # Reference with the same bf16 operand rounding the kernel uses (f32 accum).
    tb = text.astype(jnp.bfloat16).astype(jnp.float32)
    gwb = gamma_w.astype(jnp.bfloat16).astype(jnp.float32)
    bwb = beta_w.astype(jnp.bfloat16).astype(jnp.float32)
    gamma_ref = (tb @ gwb + gamma_b).reshape(b, 1, d, h, w)
    beta_ref = (tb @ bwb + beta_b).reshape(b, 1, d, h, w)
    ref_bf16 = gamma_ref * feature + beta_ref
    assert jnp.allclose(out, ref_bf16, atol=1e-4, rtol=1e-4)

    # Full-f32 module reference (loose tolerance: weights/text fed as bf16).
    gamma_f32 = (text @ gamma_w + gamma_b).reshape(b, 1, d, h, w)
    beta_f32 = (text @ beta_w + beta_b).reshape(b, 1, d, h, w)
    ref_f32 = gamma_f32 * feature + beta_f32
    assert jnp.allclose(out, ref_f32, atol=5e-2, rtol=5e-2)

    print("KERNEL_OK")
</pallas_src>

<mosaic_0001>
module attributes {stable_mosaic.version = 11 : i64} {
  func.func @_film_kernel(%arg0: i32, %arg1: memref<2x32xbf16, #tpu.memory_space<vmem>>, %arg2: memref<1x32x256xbf16, #tpu.memory_space<vmem>>, %arg3: memref<1x1x256xf32, #tpu.memory_space<vmem>>, %arg4: memref<8x128xf32, #tpu.memory_space<vmem>>, %arg5: memref<8x128xf32, #tpu.memory_space<vmem>>) attributes {dimension_semantics = [#tpu.dimension_semantics<parallel>], iteration_bounds = array<i64: 2>, scalar_prefetch = 0 : i64, scratch_operands = 0 : i64, tpu.core_type = #tpu.core_type<tc>, window_params = [{pipeline_mode = #tpu.pipeline_mode<synchronous>, transform_indices = @transform_0, window_bounds = array<i64: 2, 32>}, {transform_indices = @transform_1, window_bounds = array<i64: 1, 32, 256>}, {transform_indices = @transform_2, window_bounds = array<i64: 1, 1, 256>}, {transform_indices = @transform_3, window_bounds = array<i64: 8, 128>}, {transform_indices = @transform_4, window_bounds = array<i64: 8, 128>}]} {
    %c0 = arith.constant 0 : index
    %c0_0 = arith.constant 0 : index
    %0 = vector.load %arg1[%c0, %c0_0] : memref<2x32xbf16, #tpu.memory_space<vmem>>, vector<2x32xbf16>
    %c0_1 = arith.constant 0 : index
    %c0_2 = arith.constant 0 : index
    %c0_3 = arith.constant 0 : index
    %1 = vector.load %arg2[%c0_1, %c0_2, %c0_3] : memref<1x32x256xbf16, #tpu.memory_space<vmem>>, vector<1x32x256xbf16>
    %2 = vector.shape_cast %1 : vector<1x32x256xbf16> to vector<32x256xbf16>
    %cst = arith.constant dense<0.000000e+00> : vector<2x256xf32>
    %3 = tpu.matmul %0, %2, %cst {dimension_numbers = #tpu.dot_dimension_numbers<[1], [0], [0], [1], [0, 0, 1, 1], [], []>} : vector<2x32xbf16>, vector<32x256xbf16>, vector<2x256xf32> -> vector<2x256xf32>
    %c0_4 = arith.constant 0 : index
    %c0_5 = arith.constant 0 : index
    %c0_6 = arith.constant 0 : index
    %4 = vector.load %arg3[%c0_4, %c0_5, %c0_6] : memref<1x1x256xf32, #tpu.memory_space<vmem>>, vector<1x1x256xf32>
    %5 = vector.shape_cast %4 : vector<1x1x256xf32> to vector<1x256xf32>
    %6 = vector.broadcast %5 : vector<1x256xf32> to vector<2x256xf32>
    %7 = arith.addf %3, %6 : vector<2x256xf32>
    %8 = vector.extract_strided_slice %7 {offsets = [0, 0], sizes = [2, 128], strides = [1, 1]} : vector<2x256xf32> to vector<2x128xf32>
    %9 = vector.extract_strided_slice %7 {offsets = [0, 128], sizes = [2, 128], strides = [1, 1]} : vector<2x256xf32> to vector<2x128xf32>
    %10 = vector.shape_cast %8 : vector<2x128xf32> to vector<2x1x128xf32>
    %11 = vector.shape_cast %10 : vector<2x1x128xf32> to vector<2x1x128xf32>
    %12 = vector.broadcast %11 : vector<2x1x128xf32> to vector<2x4x128xf32>
    %13 = vector.shape_cast %12 : vector<2x4x128xf32> to vector<8x128xf32>
    %14 = vector.shape_cast %9 : vector<2x128xf32> to vector<2x1x128xf32>
    %15 = vector.shape_cast %14 : vector<2x1x128xf32> to vector<2x1x128xf32>
    %16 = vector.broadcast %15 : vector<2x1x128xf32> to vector<2x4x128xf32>
    %17 = vector.shape_cast %16 : vector<2x4x128xf32> to vector<8x128xf32>
    %c0_7 = arith.constant 0 : index
    %c0_8 = arith.constant 0 : index
    %18 = vector.load %arg4[%c0_7, %c0_8] : memref<8x128xf32, #tpu.memory_space<vmem>>, vector<8x128xf32>
    %19 = arith.mulf %13, %18 : vector<8x128xf32>
    %20 = arith.addf %19, %17 : vector<8x128xf32>
    %c0_9 = arith.constant 0 : index
    %c0_10 = arith.constant 0 : index
    %21 = vector.load %arg5[%c0_9, %c0_10] : memref<8x128xf32, #tpu.memory_space<vmem>>, vector<8x128xf32>
    tpu.vector_store %arg5[%c0_9, %c0_10], %20 {strides = array<i32>} : memref<8x128xf32, #tpu.memory_space<vmem>>, vector<8x128xf32>,
    return
  }
  func.func @transform_0(%arg0: i32) -> (i32, i32) {
    %c0_i32 = arith.constant 0 : i32
    %c0_i32_0 = arith.constant 0 : i32
    %c0_i32_1 = arith.constant 0 : i32
    return %c0_i32, %c0_i32_0 : i32, i32
  }
  func.func @transform_1(%arg0: i32) -> (i32, i32, i32) {
    %c0_i32 = arith.constant 0 : i32
    %c0_i32_0 = arith.constant 0 : i32
    %c0_i32_1 = arith.constant 0 : i32
    return %arg0, %c0_i32, %c0_i32_0 : i32, i32, i32
  }
  func.func @transform_2(%arg0: i32) -> (i32, i32, i32) {
    %c0_i32 = arith.constant 0 : i32
    %c0_i32_0 = arith.constant 0 : i32
    %c0_i32_1 = arith.constant 0 : i32
    return %arg0, %c0_i32, %c0_i32_0 : i32, i32, i32
  }
  func.func @transform_3(%arg0: i32) -> (i32, i32) {
    %c0_i32 = arith.constant 0 : i32
    %c0_i32_0 = arith.constant 0 : i32
    return %c0_i32, %arg0 : i32, i32
  }
  func.func @transform_4(%arg0: i32) -> (i32, i32) {
    %c0_i32 = arith.constant 0 : i32
    %c0_i32_0 = arith.constant 0 : i32
    return %c0_i32, %arg0 : i32, i32
  }
}

</mosaic_0001>

<bundles_post_ra>
// kernel: tpu_custom_call.1
= control target key start
LH: loop header
LB: loop body
LE: loop exit
PB: predicated region body
PF: predicated region fallthrough
CT: control target
= control target key end

     0   :  { %9 = vsyncpa [#allocation3], 0  ;;  %s1102_s0 = inlined_call_operand.hbm [shape: bf16[2,32], index: 0, kind: input, shape index: {}]   ;;  %s1103_s1 = inlined_call_operand.hbm [shape: bf16[2,32,256], index: 1, kind: input, shape index: {}]   ;;  %s1104_s2 = inlined_call_operand.vmem [shape: f32[2,1,256], index: 2, kind: input, shape index: {}]   ;;  %s1105_s3 = inlined_call_operand.hbm [shape: f32[8,256], index: 3, kind: input, shape index: {}]   ;;  %s1106_s4 = inlined_call_operand.hbm [shape: f32[8,256], index: 4, kind: output, shape index: {}]  }
   0x1   :  { %10 = vsyncpa [#allocation6], 0 }
   0x2   :  { %12 = vsyncpa [#allocation6 + $0x1], 0 }
   0x3   :  { %13 = vsyncpa [#allocation4], 0 }
   0x4   :  { %15 = vsyncpa [#allocation4 + $0x1], 0  ;;  %s861_s15 = smov 0   ;;  %s863_s16 = smov 0  }
   0x5   :  { %s865_s17 = smov 0   ;;  %s867_s18 = smov 0  }
   0x6 LB: > { %s882_s19 = sadd.s32 1, %s826_s18   ;;  %s49_s20 = sadd.s32 1, %s822_s17  ;;  %s826_s18 = sphi %s867_s18, %s1129_s18   ;;  %s822_s17 = sphi %s865_s17, %s1128_s17   ;;  %s818_s16 = sphi %s863_s16, %s1127_s16   ;;  %s814_s15 = sphi %s861_s15, %s1126_s15  }
   0x7   : > { %s46_s21 = ssub.s32 %s826_s18, %s882_s19  ;;  %p56_p0 = scmp.ne.s32.totalorder %s822_s17, %s818_s16 }
   0x8   : > { %p47_p1 = scmp.eq.s32.totalorder %s46_s21, 0  ;;  %p57_p2 = scmp.eq.s32.totalorder %s826_s18, 0 }
   0x9   : > { %p621_p4 = scmp.lt.s32.totalorder %s826_s18, 2  ;;  %s175_s23 = sand.u32 1, %s826_s18  }
   0xa   : > { %s893_s22 = scalar_select %p47_p1, %s822_s17, %s49_s20  }
   0xb   : > { %p58_p5 = por %p57_p2, %p56_p0  ;;  %s177_s24 = sand.u32 1, %s822_s17  }
   0xc   : > { %s574_s25 = sshll.u32 %s177_s24, 5  ;;  %s594_s26 = sshll.u32 %s826_s18, 9 }
   0xd   : > { %s906_s29 = scalar_lea.hbm %s1103_s1, %s594_s26  ;;  %s179_s30 = scalar_lea.vmem [#allocation5], %s574_s25 }
   0xe   : > { %s186_s5 = sshll.u32 %s179_s30, 4  ;;  %p908_p6 = pnand %p621_p4, %p58_p5  ;;  %s912_s5 = int_to_ptr.vmem [resolvable:$true] %s186_s5 }
   0xf   : > { %s914_s7 = scalar_lea.sflag [#allocation6], %s175_s23  ;;  %s668_s8 = scalar_lea.hbm %s906_s29, 512 }
  0x10   : > { %p669_p7 = scmp.ne.s32.totalorder %s906_s29, %s668_s8  ;;  %p670_p8 = pneg %p908_p6 }
  0x11   : > { %s673_s11 = scalar_lea.hbm %s1103_s1, 1024  ;;  %p674_p11 = scmp.lt.u32.totalorder %s906_s29, %s1103_s1 }
  0x12   : > { %p671_p9 = pnand %p670_p8, %p669_p7  ;;  %p675_p12 = scmp.lt.u32.totalorder %s673_s11, %s668_s8 }
  0x13   : > { %p677_p1 = scmp.lt.u32.totalorder %s668_s8, %s906_s29 }
  0x14   : > { %p672_p10 = pneg %p671_p9  ;;  %p676_p13 = por %p675_p12, %p674_p11 }
  0x16   : > { %p678_p2 = por %p677_p1, %p676_p13 }
  0x18   : > { %p679_p4 = pnand %p678_p2, %p672_p10 }
  0x1a   : > { %682 = shalt.err (!%p679_p4)
}
  0x1b   : > { %s683_s14 = scalar_lea.vmem %s912_s5, 512  ;;  %s828_s20 = smov [#allocation5]  }
  0x1c   : > { %p684_p5 = scmp.ne.s32.totalorder %s912_s5, %s683_s14  ;;  %s688_s21 = sshll.u32 %s828_s20, 4  ;;  %s689_s21 = int_to_ptr.vmem [resolvable:$false] %s688_s21 }
  0x1d   : > { %s690_s23 = scalar_lea.vmem %s689_s21, 1024  ;;  %p691_p3 = scmp.lt.s32.totalorder %s912_s5, %s689_s21 }
  0x1e   : > { %p686_p7 = pnand %p684_p5, %p670_p8  ;;  %p692_p11 = scmp.lt.s32.totalorder %s690_s23, %s683_s14 }
  0x20   : > { %p687_p9 = pneg %p686_p7  ;;  %p693_p12 = por %p692_p11, %p691_p3 }
  0x22   : > { %p694_p13 = pnand %p693_p12, %p687_p9 }
  0x24   : > { %697 = shalt.err (!%p694_p13)
}
  0x25   : > { %s829_s25 = smov 128   ;;  %s830_s26 = smov 8  }
  0x26   : > { %612 = dma.hbm_to_vmem [thread:$0]  (!%p908_p6), %s906_s29, 512, %s912_s5, %s914_s7, %s829_s25, %s829_s25, %s830_s26  }
  0x27   : > { %s943_s27 = sadd.s32 4294967295, %s826_s18   ;;  %s570_s28 = sadd.s32 4294967294, %s826_s18  }
  0x28   : > { %p62_p3 = scmp.ne.s32.totalorder %s818_s16, %s814_s15  ;;  %p1107_p10 = scmp.eq.s32.totalorder %s943_s27, 0 }
  0x29   : > { %p138_p1 = scmp.eq.s32.totalorder %s943_s27, 1  ;;  %p144_p2 = scmp.eq.s32.totalorder %s570_s28, 1 }
  0x2a   : > { %p952_p4 = por %p1107_p10, %p62_p3  ;;  %p571_p5 = scmp.ge.s32.totalorder %s826_s18, 1 }
  0x2b   : > { %p960_p7 = por %p138_p1, %p56_p0  ;;  %p964_p9 = por %p144_p2, %p62_p3 }
  0x2c   : > { %s1113_s30 = scalar_select %p952_p4, 1, 0 }
  0x2d   : > { %s1114_s29 = scalar_select %p960_p7, 1, 0 }
  0x2e   : > { %s1115_s5 = scalar_select %p964_p9, 1, 0 }
  0x2f   : > { %p151_p11 = scmp.lt.s32.totalorder %s826_s18, 3  ;;  %s577_s8 = sshll.u32 %s177_s24, 3 }
  0x30   : > { %s831_s10 = smov [#allocation2]   ;;  %s578_s12 = sshll.u32 %s826_s18, 7 }
  0x31   : > { %p971_p12 = pnand %p571_p5, %p151_p11  ;;  %s164_s11 = sshll.u32 %s831_s10, 4  ;;  %s975_s11 = int_to_ptr.vmem [resolvable:$true] %s164_s11 }
  0x32   : > { %s983_s20 = scalar_lea.hbm %s1105_s3, %s578_s12  ;;  %s207_s24 = scalar_lea.vmem [#allocation7], %s577_s8 }
  0x33   : > { %s1116_s9 = scalar_select %p971_p12, 1, 0 }
  0x34   : > { %p605_p0 = pneg %p971_p12  ;;  %s214_s21 = sshll.u32 %s207_s24, 4  ;;  %s215_s21 = int_to_ptr.vmem [resolvable:$true] %s214_s21 }
  0x35   : > { %s698_s25 = scalar_lea.hbm %s983_s20, 128  ;;  %s703_s10 = scalar_lea.hbm %s1105_s3, 256 }
  0x36   : > { %p987_p13 = pnand %p605_p0, %p1107_p10  ;;  %p699_p3 = scmp.ne.s32.totalorder %s983_s20, %s698_s25 }
  0x37   : > { %p704_p5 = scmp.lt.u32.totalorder %s983_s20, %s1105_s3  ;;  %p705_p11 = scmp.lt.u32.totalorder %s703_s10, %s698_s25 }
  0x38   : > { %s1117_s23 = scalar_select %p987_p13, 1, 0 }
  0x39   : > { %p701_p1 = pnand %p699_p3, %p670_p8  ;;  %p706_p0 = por %p705_p11, %p704_p5 }
  0x3a   : > { %p707_p10 = scmp.lt.u32.totalorder %s698_s25, %s983_s20 }
  0x3b   : > { %p702_p2 = pneg %p701_p1 }
  0x3c   : > { %p708_p9 = por %p707_p10, %p706_p0 }
  0x3e   : > { %p709_p7 = pnand %p708_p9, %p702_p2 }
  0x40   : > { %712 = shalt.err (!%p709_p7)
}
  0x41   : > { %s713_s8 = scalar_lea.vmem %s215_s21, 128  ;;  %s832_s14 = smov [#allocation7]  }
  0x42   : > { %p714_p4 = scmp.ne.s32.totalorder %s215_s21, %s713_s8  ;;  %s718_s24 = sshll.u32 %s832_s14, 4  ;;  %s719_s24 = int_to_ptr.vmem [resolvable:$false] %s718_s24 }
  0x43   : > { %s720_s26 = scalar_lea.vmem %s719_s24, 256  ;;  %p721_p12 = scmp.lt.s32.totalorder %s215_s21, %s719_s24 }
  0x44   : > { %p716_p3 = pnand %p714_p4, %p670_p8  ;;  %p722_p13 = scmp.lt.s32.totalorder %s720_s26, %s713_s8 }
  0x46   : > { %p717_p1 = pneg %p716_p3  ;;  %p723_p5 = por %p722_p13, %p721_p12 }
  0x48   : > { %p724_p11 = pnand %p723_p5, %p717_p1 }
  0x4a   : > { %727 = shalt.err (!%p724_p11)
}
  0x4b   : > { %615 = dma.hbm_to_vmem [thread:$0]  (!%p908_p6), %s983_s20, 128, %s215_s21, %s914_s7  }
  0x4c   : > { %s728_s10 = scalar_lea.hbm %s1102_s0, 16  ;;  %p1118_p10 = scmp.ne.s32.totalorder %s1117_s23, 0 }
  0x4d   : > { %p729_p8 = scmp.ne.s32.totalorder %s1102_s0, %s728_s10  ;;  %p735_p12 = scmp.lt.u32.totalorder %s728_s10, %s1102_s0 }
  0x4e   : > { %p730_p4 = pneg %p1118_p10 }
  0x50   : > { %p731_p7 = pnand %p730_p4, %p729_p8 }
  0x52   : > { %p732_p9 = pneg %p731_p7 }
  0x54   : > { %p737_p13 = pnand %p735_p12, %p732_p9 }
  0x56   : > { %740 = shalt.err (!%p737_p13)
}
  0x57   : > { %s741_s6 = scalar_lea.vmem %s975_s11, 16  ;;  %s748_s7 = scalar_lea.vmem %s975_s11, 32 }
  0x58   : > { %p742_p6 = scmp.ne.s32.totalorder %s975_s11, %s741_s6  ;;  %p749_p3 = scmp.lt.s32.totalorder %s975_s11, %s975_s11 }
  0x59   : > { %p750_p1 = scmp.lt.s32.totalorder %s748_s7, %s741_s6 }
  0x5a   : > { %p744_p2 = pnand %p742_p6, %p730_p4 }
  0x5b   : > { %p751_p5 = por %p750_p1, %p749_p3 }
  0x5c   : > { %p745_p0 = pneg %p744_p2 }
  0x5e   : > { %p752_p11 = pnand %p751_p5, %p745_p0 }
  0x60   : > { %755 = shalt.err (!%p752_p11)
}
  0x61   : > { %608 = dma.hbm_to_vmem [thread:$0]  (!%p1118_p10), %s1102_s0, 16, %s975_s11, [#allocation3]  }
  0x62   : > { %p1119_p8 = scmp.ne.s32.totalorder %s1116_s9, 0 }
  0x63   : > { %p1120_p4 = scmp.eq.s32.totalorder (!%p1119_p8), %s943_s27, 0 }
  0x64   : > { %223 = sbr.rel (%p1119_p8) target bundleno = 364 (0x16c), region = 36 }
  0x6b   : > { %801 = dma.done.wait (%p1120_p4), [#allocation3], 16   ;;  %p1121_p7 = pmov %p1120_p4 }
  0x6c   : > { %s229_s24 = sand.u32 1, %s943_s27   ;;  %s1041_s26 = sand.u32 1, %s818_s16  }
  0x6d   : > { %803 = vsyncadd (%p1121_p7), [#allocation3], 4294967280  ;;  %s581_s23 = sshll.u32 %s1041_s26, 5  ;;  %s230_s25 = scalar_lea.sflag [#allocation6], %s229_s24 }
  0x6e   : > { %s233_s28 = scalar_lea.vmem [#allocation5], %s581_s23  ;;  %p1122_p10 = scmp.ne.s32.totalorder %s1113_s30, 0 }
  0x70   : > { %805 = dma.done.wait (%p1122_p10), %s230_s25, 640  }
  0x71   : > { %807 = vsyncadd (%p1122_p10), %s230_s25, 4294966656  ;;  %v833_v0 = vmov 0   ;;  %v661_v1 = vld [vmem:[%s233_s28 + $0x4] ss:$8 sps:$4 sm:$0xff]   ;;  %v663_v2 = vld [vmem:[%s233_s28] ss:$8 sps:$4 sm:$0xff]   ;;  %v288_v6 = vlaneseq }
  0x72   : > { %354 = vmatprep.mubr.bf16.mxu0 %v833_v0  ;;  %322 = vmatprep.subr.bf16.mxu0 %v661_v1  ;;  %v664_v3 = vld [vmem:[%s233_s28 + $0x14] ss:$8 sps:$4 sm:$0xff]   ;;  %v666_v4 = vld [vmem:[%s233_s28 + $0x10] ss:$8 sps:$4 sm:$0xff]   ;;  %vm318_vm0 = vcmask 261120   ;;  %p276_p9 = scmp.lt.s32.totalorder %s943_s27, 1 }
  0x73   : > { %323 = vmatpush1.bf16.msra.mxu0 %v663_v2  ;;  %v281_v5 = vld [vmem:[#allocation2] sm:$0x1]  ;;  %v289_v7 = vshrl.u32 %v288_v6, 7  ;;  %v834_v8 = vmov 1966171168   ;;  %s582_s13 = sshll.u32 %s1041_s26, 3 }
  0x74   : > { %324 = vmatprep.subr.bf16.mxu0 %v664_v3  ;;  %s277_s9 = scalar_select %p276_p9, %s943_s27, 1  ;;  %v365_v9 = vunpack.c.l.s4 %v834_v8 }
  0x75   : > { %v290_v10 = vsub.s32 0, %v289_v7  ;;  %v294_v12 = vsub.s32 1, %v289_v7  ;;  %s242_s8 = scalar_lea.vmem [#allocation7], %s582_s13  ;;  %s591_s14 = sshll.u32 %s943_s27, 7 }
  0x76   : > { %s584_s30 = sshll.u32 %s277_s9, 1  ;;  %v366_v13 = vunpack.c.0.s8 %v365_v9  ;;  %v429_v25 = vld [vmem:[%s242_s8] sm:$0xff]  ;;  %s275_s6 = scalar_lea.vmem [#allocation8], %s582_s13 }
  0x77   : > { %325 = vmatpush1.bf16.msra.mxu0 %v666_v4  ;;  %s279_s12 = scalar_lea.vmem %s1104_s2, %s584_s30  ;;  %v431_v32 = vcombine.high %v429_v25, %v429_v25  ;;  %s456_s7 = sshll.u32 %s275_s6, 4  ;;  %s1060_s7 = int_to_ptr.vmem [resolvable:$true] %s456_s7 }
  0x78   : > { %v286_v11 = vld [vmem:[%s279_s12] sm:$0x3]  ;;  %v369_v16 = vsub.s32 %v366_v13, %v289_v7  ;;  %s1058_s24 = scalar_lea.hbm %s1106_s4, %s591_s14  ;;  %s443_s23 = scalar_lea.sflag [#allocation4], %s1041_s26 }
  0x79   : > { %v291_v14 = vrot.slane %v286_v11, %v290_v10  ;;  %v295_v15 = vrot.slane %v286_v11, %v294_v12  ;;  %s756_s25 = scalar_lea.vmem %s1060_s7, 128  ;;  %p1123_p13 = scmp.ne.s32.totalorder %s1114_s29, 0 }
  0x7a   : > { %589 = vmatmul.mubr.msk.bf16.vlgmr.msra.gmra.mrb[0].mxu0 %vm318_vm0, %v281_v5  ;;  %p757_p12 = scmp.ne.s32.totalorder %s1060_s7, %s756_s25  ;;  %s835_s27 = smov [#allocation8]  }
  0x7b   : > { %s760_s28 = sshll.u32 %s835_s27, 4  ;;  %s761_s28 = int_to_ptr.vmem [resolvable:$false] %s760_s28 }
  0x7c   : > { %p758_p6 = pnand %p757_p12, %p1123_p13  ;;  %s762_s9 = scalar_lea.vmem %s761_s28, 256 }
  0x7d   : > { %p763_p0 = scmp.lt.s32.totalorder %s1060_s7, %s761_s28  ;;  %p764_p3 = scmp.lt.s32.totalorder %s762_s9, %s756_s25 }
  0x7e   : > { %p759_p2 = pneg %p758_p6 }
  0x7f   : > { %p765_p1 = por %p764_p3, %p763_p0 }
  0x81   : > { %p766_p5 = pnand %p765_p1, %p759_p2 }
 0x14d   : > { %v356_v17 = vpop.f32.mrb[0].mxu0 }
 0x14e   : > { %v357_v18 = vadd.f32 %v356_v17, %v291_v14  ;;  %v358_v19 = vpop.f32.mrb[1].mxu0 }
 0x14f   : > { %v359_v20 = vadd.f32 %v358_v19, %v295_v15  ;;  %v360_v21 = vpop.f32.mrb[2].mxu0 }
 0x150   : > { %v370_v22 = vrot.slane %v357_v18, %v369_v16  ;;  %v361_v23 = vpop.f32.mrb[3].mxu0 }
 0x151   : > { %v403_v24 = vrot.slane %v359_v20, %v369_v16 }
 0x152   : > { %v371_v26 = vcombine.high %v370_v22, %v370_v22  ;;  %v378_v27 = vrot.slane %v370_v22, %v369_v16 }
 0x153   : > { %v404_v28 = vcombine.high %v403_v24, %v403_v24  ;;  %v411_v29 = vrot.slane %v403_v24, %v369_v16 }
 0x154   : > { %v385_v30 = vrot.slane %v371_v26, %v369_v16  ;;  %v389_v31 = vrot.slane %v378_v27, %v290_v10 }
 0x155   : > { %v418_v33 = vrot.slane %v404_v28, %v369_v16  ;;  %v422_v34 = vrot.slane %v411_v29, %v290_v10 }
 0x156   : > { %v393_v35 = vrot.slane %v385_v30, %v290_v10  ;;  %v433_v36 = vmul.f32 %v429_v25, %v389_v31 }
 0x157   : > { %v426_v37 = vrot.slane %v418_v33, %v290_v10 }
 0x158   : > { %v434_v38 = vmul.f32 %v431_v32, %v393_v35  ;;  %v435_v39 = vadd.f32 %v433_v36, %v422_v34 }
 0x15a   : > { %v436_v40 = vadd.f32 %v434_v38, %v426_v37 }
 0x15c   : > { %v439_v41 = vcombine.low %v435_v39, %v436_v40 }
 0x15e   : > { %441 = vst [vmem:[%s275_s6] sm:$0xff] %v439_v41 }
 0x15f   : > { %769 = shalt.err (!%p766_p5)
}
 0x160   : > { %s770_s26 = scalar_lea.hbm %s1058_s24, 128  ;;  %s774_s10 = scalar_lea.hbm %s1106_s4, 256 }
 0x161   : > { %p771_p11 = scmp.ne.s32.totalorder %s1058_s24, %s770_s26  ;;  %p775_p7 = scmp.lt.u32.totalorder %s1058_s24, %s1106_s4 }
 0x162   : > { %p776_p10 = scmp.lt.u32.totalorder %s774_s10, %s770_s26  ;;  %p778_p12 = scmp.lt.u32.totalorder %s770_s26, %s1058_s24 }
 0x163   : > { %p772_p8 = pnand %p771_p11, %p1123_p13 }
 0x164   : > { %p777_p9 = por %p776_p10, %p775_p7 }
 0x165   : > { %p773_p4 = pneg %p772_p8 }
 0x166   : > { %p779_p6 = por %p778_p12, %p777_p9 }
 0x168   : > { %p780_p2 = pnand %p779_p6, %p773_p4 }
 0x16a   : > { %783 = shalt.err (!%p780_p2)
}
 0x16b   : > { %603 = dma.vmem_to_hbm [thread:$0]  (%p1123_p13), %s1060_s7, 128, %s1058_s24, %s443_s23  }
 0x16c PF: > { %s468_s8 = sand.u32 1, %s814_s15   ;;  %p1124_p0 = scmp.ne.s32.totalorder %s1115_s5, 0 }
 0x16d   : > { %p1125_p3 = scmp.ge.s32.totalorder %s826_s18, 2  ;;  %s469_s14 = scalar_lea.sflag [#allocation4], %s468_s8 }
 0x16f   : > { %p617_p1 = pnand %p1125_p3, %p1124_p0 }
 0x171   : > { %809 = dma.done.wait (!%p617_p1), %s469_s14, 128  }
 0x172   : > { %811 = vsyncadd (!%p617_p1), %s469_s14, 4294967168  ;;  %p18_p5 = scmp.ge.s32.totalorder %s882_s19, 4   ;;  %s1126_s15 = smov %s818_s16 }
 0x173   : > { %s1127_s16 = smov %s822_s17  ;;  %s1128_s17 = smov %s893_s22 }
 0x174   : > { %s1129_s18 = smov %s882_s19  ;;  %20 = sbr.rel (!%p18_p5) target bundleno = 6 (0x6), region = 100 }
 0x17b   :  { %474 = vsyncpa [#allocation3], 1 }
 0x17c   :  { %476 = vsyncpa [#allocation3 + $0x1], 1 }
 0x17d   :  { %477 = vsyncpa [#allocation6], 1 }
 0x17e   :  { %479 = vsyncpa [#allocation6 + $0x1], 1 }
 0x17f   :  { %480 = vsyncpa [#allocation4], 1 }
 0x180   :  { %482 = vsyncpa [#allocation4 + $0x1], 1 }

</bundles_post_ra>
